<compile_context>
chip_gen: v7x
topology: tpu7x:2x2x1
jax: 0.10.0
libtpu: 0.0.40
codegen_flags: <defaults>
</compile_context>

<pallas_src>
import functools

import numpy as np
import jax
import jax.numpy as jnp
from jax import lax
from jax.experimental import pallas as pl
from jax.experimental.pallas import tpu as pltpu


def get_rainbow_colors(size):
    # Deterministic piecewise-linear "jet"-style colormap (stand-in for
    # matplotlib's jet; synthetic init, no colormap file needed).
    t = np.arange(size, dtype=np.float32) / max(size - 1, 1)
    r = np.clip(1.5 - np.abs(4.0 * t - 3.0), 0.0, 1.0)
    g = np.clip(1.5 - np.abs(4.0 * t - 2.0), 0.0, 1.0)
    b = np.clip(1.5 - np.abs(4.0 * t - 1.0), 0.0, 1.0)
    return np.stack([r, g, b], axis=-1).astype(np.float32)


def _overlay_kernel(tracks_ref, col4_ref, vid_ref, out_ref,
                    colw_scr, py_scr, xmatch_scr, *,
                    H, W, h_tile, overlay_factor, tb):
    """Overlay `tb` frames for one (frame-block, row-tile) grid step.

    Separable scatter: per channel c,
        frame_c = (colw_c * y_match) @ x_match^T     # (h_tile,4N) x (4N,W)
    with y_match[h,k] = [py_k == row h] and x_match[w,k] = [px_k == col w].
    Out-of-bounds / invisible contributions carry weight 0 (wm), so any index
    aliasing is harmless (same invariant as the PyTorch reference).
    """
    eps = 0.01
    N = tracks_ref.shape[2]
    f = overlay_factor

    # ---- per-frame prep, hoisted out of the row-tile axis.  Row axis (grid
    # axis 1) is "arbitrary" and innermost, so row_tile==0 runs first for
    # every frame block and the scratch stays valid for the remaining rows.
    @pl.when(pl.program_id(1) == 0)
    def _prep():
        col4 = col4_ref[...]                                         # (3, 4N)
        col_ids = lax.broadcasted_iota(
            jnp.int32, (W, 4 * N), 0).astype(jnp.float32)            # (W, 4N)

        def prep_body(t, carry):
            # Lane-dense (1, N) prep (tracks host-transposed to (3, N)).
            tr = tracks_ref[t]                                       # (3, N)
            x, y, vis = tr[0:1, :], tr[1:2, :], tr[2:3, :]
            visb = (vis != 0.0).astype(jnp.float32)                  # torch vis.bool()

            fx = jnp.floor(x)
            fy = jnp.floor(y)
            w_n = fy + 1.0 - y + eps
            w_s = y - fy + eps
            w_w = fx + 1.0 - x + eps
            w_e = x - fx + eps

            # 4 cardinal neighbors (NW, SW, NE, SE) stacked along the lane axis.
            px = jnp.concatenate([fx, fx, fx + 1.0, fx + 1.0], axis=1)      # (1,4N)
            py = jnp.concatenate([fy, fy + 1.0, fy, fy + 1.0], axis=1)      # (1,4N)
            w = jnp.concatenate([w_n * w_w, w_s * w_w, w_n * w_e, w_s * w_e],
                                axis=1)                                      # (1,4N)
            vis4 = jnp.concatenate([visb, visb, visb, visb], axis=1)         # (1,4N)

            inb = ((px >= 0.0) & (px <= float(W - 1)) &
                   (py >= 0.0) & (py <= float(H - 1))).astype(jnp.float32)
            wm = w * inb * vis4                                              # (1,4N)

            colw_scr[t] = jnp.concatenate([col4 * wm, wm], axis=0)           # (4,4N)
            py_scr[t] = py                                                   # (1,4N)
            xmatch_scr[t] = (px == col_ids).astype(jnp.float32)              # (W,4N)
            return carry

        lax.fori_loop(0, tb, prep_body, 0)

    # ---- per row-tile compute / blend -----------------------------------
    row_ids = (lax.broadcasted_iota(jnp.int32, (h_tile, 4 * N), 0)
               + pl.program_id(1) * h_tile).astype(jnp.float32)              # (h_tile,4N)
    dn = (((1,), (1,)), ((), ()))              # contract the 4N axis of both operands

    def frame_body(t, carry):
        colw = colw_scr[t]                                                   # (4, 4N)
        py = py_scr[t]                                                       # (1, 4N)
        xmt = xmatch_scr[t]                                                  # (W, 4N)
        ymt = (py == row_ids).astype(jnp.float32)                            # (h_tile,4N)

        def chan(c):
            a = colw[c:c + 1, :] * ymt                                       # (h_tile,4N)
            return lax.dot_general(a, xmt, dn,
                                   preferred_element_type=jnp.float32)       # (h_tile,W)

        r, g, b, alpha = chan(0), chan(1), chan(2), chan(3)
        nonzero = alpha > 0.0
        # One exact divide per pixel, reused by all 3 channels (exact 1/x keeps
        # 1e-4 parity with the reference; approx reciprocal would relax that).
        inv = 1.0 / jnp.where(nonzero, alpha, 1.0)
        fa = jnp.where(nonzero, f, 0.0)                                      # f * alpha_mask
        rgb = jnp.stack([r * inv, g * inv, b * inv], axis=0)                 # (3,h_tile,W)

        vid_t = vid_ref[t]                                                   # (3,h_tile,W)
        out_ref[t] = vid_t + fa[None] * (rgb - vid_t)
        return carry

    # No unrolling: per-frame work is thousands of cycles; bounding live
    # temporaries matters more than the ~0.35us/step saving (v7x: 64 MiB VMEM).
    lax.fori_loop(0, tb, frame_body, 0)


def _choose_h_tile(H, max_rows):
    """Row-tile height: a multiple of 8, at most max_rows, covering H when small."""
    max_rows = max(8, (int(max_rows) // 8) * 8)
    h8 = ((H + 7) // 8) * 8
    return min(max_rows, h8)


def visualizer_overlay_forward(video, tracks, col, overlay_factor=0.75,
                               frames_per_block=4, max_h_rows=128,
                               vmem_limit_mb=32):
    """Pallas equivalent of Visualizer.forward(data, mode='overlay').

    video : (T, C=3, H, W) float32  (PyTorch NCHW)
    tracks: (T, N, 3)      float32  ([x, y, visibility])
    col   : (N, 3)         float32  (rainbow colors)
    returns (video_out (T, C, H, W), x_change (T,), y_change (T,))
    """
    T, C, H, W = video.shape
    N = tracks.shape[1]
    assert C == 3, "overlay blending assumes 3-channel RGB video"

    # Keep the frame-block ("parallel") grid axis >= 2 blocks so v7x's two
    # TensorCores both get work on short clips.
    tb = max(1, min(int(frames_per_block), -(-T // 2)))
    T_pad = -(-T // tb) * tb

    h_tile = _choose_h_tile(H, max_h_rows)
    H_pad = -(-H // h_tile) * h_tile

    vid = video.astype(jnp.float32)
    tracks_t = jnp.transpose(tracks.astype(jnp.float32), (0, 2, 1))   # (T, 3, N)
    if H_pad != H:
        # Padded rows never match any in-bounds py -> alpha==0 -> passthrough;
        # sliced off below.  (No flat-HW tiling, so non-128-multiple W is fine.)
        vid = jnp.pad(vid, ((0, 0), (0, 0), (0, H_pad - H), (0, 0)))
    if T_pad != T:
        # Padded frames have vis == 0 everywhere -> passthrough; sliced off below.
        vid = jnp.pad(vid, ((0, T_pad - T), (0, 0), (0, 0), (0, 0)))
        tracks_t = jnp.pad(tracks_t, ((0, T_pad - T), (0, 0), (0, 0)))

    colT = jnp.transpose(col.astype(jnp.float32), (1, 0))             # (3, N)
    col4 = jnp.concatenate([colT, colT, colT, colT], axis=1)          # (3, 4N)

    kernel = functools.partial(_overlay_kernel, H=H, W=W, h_tile=h_tile,
                               overlay_factor=float(overlay_factor), tb=tb)

    out = pl.pallas_call(
        kernel,
        out_shape=jax.ShapeDtypeStruct((T_pad, C, H_pad, W), jnp.float32),
        grid_spec=pltpu.PrefetchScalarGridSpec(
            num_scalar_prefetch=0,
            grid=(T_pad // tb, H_pad // h_tile),
            in_specs=[
                pl.BlockSpec((tb, 3, N), lambda t, r: (t, 0, 0)),             # tracks
                pl.BlockSpec((3, 4 * N), lambda t, r: (0, 0)),                # colors
                pl.BlockSpec((tb, C, h_tile, W), lambda t, r: (t, 0, r, 0)),  # video
            ],
            out_specs=pl.BlockSpec((tb, C, h_tile, W), lambda t, r: (t, 0, r, 0)),
            scratch_shapes=[
                pltpu.VMEM((tb, 4, 4 * N), jnp.float32),     # colw per frame
                pltpu.VMEM((tb, 1, 4 * N), jnp.float32),     # py per frame
                pltpu.VMEM((tb, W, 4 * N), jnp.float32),     # x indicator per frame
            ],
        ),
        compiler_params=pltpu.CompilerParams(
            dimension_semantics=("parallel", "arbitrary"),
            vmem_limit_bytes=int(vmem_limit_mb) * 1024 * 1024),
    )(tracks_t, col4, vid)

    video_out = out[:T, :, :H, :]

    # x_change / y_change: mean of visible track positions (-10000 if none).
    # Tiny reduction; done in plain XLA instead of a second kernel output path.
    visf = (tracks[..., 2] != 0).astype(jnp.float32)
    cnt = visf.sum(axis=1)
    xs = (tracks[..., 0].astype(jnp.float32) * visf).sum(axis=1)
    ys = (tracks[..., 1].astype(jnp.float32) * visf).sum(axis=1)
    safe = jnp.maximum(cnt, 1.0)
    x_change = jnp.where(cnt > 0, xs / safe, -10000.0)
    y_change = jnp.where(cnt > 0, ys / safe, -10000.0)
    return video_out, x_change, y_change


def _reference_overlay(video, tracks, col, f, H, W):
    """Pure NumPy port of the PyTorch plot_overlay / draw path (for checking)."""
    T, C, _, _ = video.shape
    out = np.zeros_like(video)
    xcs = np.zeros(T, np.float32)
    ycs = np.zeros(T, np.float32)
    eps = 0.01
    for t in range(T):
        pos = tracks[t, :, :2]
        visb = tracks[t, :, 2] != 0
        p = pos[visb]
        c = col[visb]
        n = p.shape[0]
        if n > 0:
            xcs[t] = p[:, 0].sum() / n
            ycs[t] = p[:, 1].sum() / n
        else:
            xcs[t] = -10000.0
            ycs[t] = -10000.0
        fx, fy = np.floor(p[:, 0]), np.floor(p[:, 1])
        w_n = fy + 1 - p[:, 1] + eps
        w_s = p[:, 1] - fy + eps
        w_w = fx + 1 - p[:, 0] + eps
        w_e = p[:, 0] - fx + eps
        npos = np.concatenate([np.stack([fx, fy], -1), np.stack([fx, fy + 1], -1),
                               np.stack([fx + 1, fy], -1), np.stack([fx + 1, fy + 1], -1)], 0)
        ww = np.concatenate([w_n * w_w, w_s * w_w, w_n * w_e, w_s * w_e], 0)[:, None]
        cc = np.concatenate([np.tile(c, (4, 1)) * ww, ww], -1)
        inb = ((npos[:, 0] >= 0) & (npos[:, 0] <= W - 1) &
               (npos[:, 1] >= 0) & (npos[:, 1] <= H - 1))
        npos, cc = npos[inb], cc[inb]
        idx = (np.round(npos[:, 1]) * W + np.round(npos[:, 0])).astype(np.int64)
        frame = np.zeros((H * W, 4), np.float32)
        np.add.at(frame, idx, cc.astype(np.float32))
        frame = frame.reshape(H, W, 4)
        rgb, alpha = frame[..., :3].copy(), frame[..., 3]
        nz = alpha > 0
        rgb[nz] /= alpha[nz][..., None]
        ab = nz[..., None].astype(np.float32)
        tgt = video[t].transpose(1, 2, 0)
        blend = f * ab * rgb + (1 - f * ab) * tgt
        out[t] = blend.transpose(2, 0, 1)
    return out, xcs, ycs


if __name__ == "__main__":
    T, C, H, W, N = 7, 3, 32, 16, 64
    overlay_factor = 0.75

    key = jax.random.PRNGKey(0)
    k1, k2, k3, k4 = jax.random.split(key, 4)
    xs = jax.random.uniform(k1, (T, N, 1), minval=-2.0, maxval=float(W) + 1.0,
                            dtype=jnp.float32)
    ys = jax.random.uniform(k4, (T, N, 1), minval=-2.0, maxval=float(H) + 1.0,
                            dtype=jnp.float32)
    vis = (jax.random.uniform(k2, (T, N)) < 0.8).astype(jnp.float32)
    vis = vis.at[0].set(0.0)   # frame 0: no visible tracks -> x/y change = -10000
    tracks = jnp.concatenate([xs, ys, vis[..., None]], axis=-1)        # (T, N, 3)
    video = jax.random.uniform(k3, (T, C, H, W), dtype=jnp.float32)    # NCHW
    col = jnp.asarray(get_rainbow_colors(N))                           # (N, 3)

    ref_out, ref_xc, ref_yc = _reference_overlay(
        np.asarray(video), np.asarray(tracks), np.asarray(col), overlay_factor, H, W)

    # Exercise both a single row-tile per frame and the multi-row-tile path
    # (the latter reuses the hoisted per-frame prep scratch across row tiles,
    # and both pad T: T=7 -> T_pad=8).
    for fpb, max_rows in ((4, 128), (2, 8)):
        out, x_change, y_change = visualizer_overlay_forward(
            video, tracks, col, overlay_factor=overlay_factor,
            frames_per_block=fpb, max_h_rows=max_rows)
        jax.block_until_ready((out, x_change, y_change))

        assert np.allclose(np.asarray(out), ref_out, atol=1e-4), \
            float(np.abs(np.asarray(out) - ref_out).max())
        assert np.allclose(np.asarray(x_change), ref_xc, atol=1e-3)
        assert np.allclose(np.asarray(y_change), ref_yc, atol=1e-3)

    print("KERNEL_OK")
</pallas_src>

<mosaic_0001>
module attributes {stable_mosaic.version = 11 : i64} {
  func.func @_overlay_kernel(%arg0: i32, %arg1: i32, %arg2: memref<4x3x64xf32, #tpu.memory_space<vmem>>, %arg3: memref<3x256xf32, #tpu.memory_space<vmem>>, %arg4: memref<4x3x32x16xf32, #tpu.memory_space<vmem>>, %arg5: memref<4x3x32x16xf32, #tpu.memory_space<vmem>>, %arg6: memref<4x4x256xf32, #tpu.memory_space<vmem>>, %arg7: memref<4x1x256xf32, #tpu.memory_space<vmem>>, %arg8: memref<4x16x256xf32, #tpu.memory_space<vmem>>) attributes {dimension_semantics = [#tpu.dimension_semantics<parallel>, #tpu.dimension_semantics<arbitrary>], iteration_bounds = array<i64: 2, 1>, scalar_prefetch = 0 : i64, scratch_operands = 3 : i64, tpu.core_type = #tpu.core_type<tc>, window_params = [{transform_indices = @transform_0, window_bounds = array<i64: 4, 3, 64>}, {pipeline_mode = #tpu.pipeline_mode<synchronous>, transform_indices = @transform_1, window_bounds = array<i64: 3, 256>}, {transform_indices = @transform_2, window_bounds = array<i64: 4, 3, 32, 16>}, {transform_indices = @transform_3, window_bounds = array<i64: 4, 3, 32, 16>}]} {
    %c0_i32 = arith.constant 0 : i32
    %0 = arith.cmpi eq, %arg1, %c0_i32 : i32
    %1 = arith.extui %0 : i1 to i32
    %c0_i32_0 = arith.constant 0 : i32
    %2 = arith.cmpi ne, %1, %c0_i32_0 : i32
    scf.if %2 {
      %c0 = arith.constant 0 : index
      %c0_3 = arith.constant 0 : index
      %9 = vector.load %arg3[%c0, %c0_3] : memref<3x256xf32, #tpu.memory_space<vmem>>, vector<3x256xf32>
      %10 = tpu.iota {dimensions = array<i32: 0>} : vector<16x256xi32>
      %11 = arith.sitofp %10 : vector<16x256xi32> to vector<16x256xf32>
      %c0_i32_4 = arith.constant 0 : i32
      %c4_i32_5 = arith.constant 4 : i32
      %12 = arith.addi %c0_i32_4, %c4_i32_5 : i32
      %c1_i32_6 = arith.constant 1 : i32
      scf.for %arg9 = %c0_i32_4 to %12 step %c1_i32_6  : i32 {
        %13 = arith.index_cast %arg9 : i32 to index
        %c0_8 = arith.constant 0 : index
        %c0_9 = arith.constant 0 : index
        %14 = vector.load %arg2[%13, %c0_8, %c0_9] : memref<4x3x64xf32, #tpu.memory_space<vmem>>, vector<1x3x64xf32>
        %15 = vector.shape_cast %14 : vector<1x3x64xf32> to vector<3x64xf32>
        %16 = vector.extract_strided_slice %15 {offsets = [0, 0], sizes = [1, 64], strides = [1, 1]} : vector<3x64xf32> to vector<1x64xf32>
        %17 = vector.extract_strided_slice %15 {offsets = [1, 0], sizes = [1, 64], strides = [1, 1]} : vector<3x64xf32> to vector<1x64xf32>
        %18 = vector.extract_strided_slice %15 {offsets = [2, 0], sizes = [1, 64], strides = [1, 1]} : vector<3x64xf32> to vector<1x64xf32>
        %cst = arith.constant 0.000000e+00 : f32
        %19 = vector.broadcast %cst : f32 to vector<1x64xf32>
        %20 = arith.cmpf one, %18, %19 : vector<1x64xf32>
        %21 = arith.extui %20 : vector<1x64xi1> to vector<1x64xi32>
        %22 = arith.sitofp %21 : vector<1x64xi32> to vector<1x64xf32>
        %23 = math.floor %16 : vector<1x64xf32>
        %24 = math.floor %17 : vector<1x64xf32>
        %cst_10 = arith.constant 1.000000e+00 : f32
        %25 = vector.broadcast %cst_10 : f32 to vector<1x64xf32>
        %26 = arith.addf %24, %25 : vector<1x64xf32>
        %27 = arith.subf %26, %17 : vector<1x64xf32>
        %cst_11 = arith.constant 0.00999999977 : f32
        %28 = vector.broadcast %cst_11 : f32 to vector<1x64xf32>
        %29 = arith.addf %27, %28 : vector<1x64xf32>
        %30 = arith.subf %17, %24 : vector<1x64xf32>
        %cst_12 = arith.constant 0.00999999977 : f32
        %31 = vector.broadcast %cst_12 : f32 to vector<1x64xf32>
        %32 = arith.addf %30, %31 : vector<1x64xf32>
        %cst_13 = arith.constant 1.000000e+00 : f32
        %33 = vector.broadcast %cst_13 : f32 to vector<1x64xf32>
        %34 = arith.addf %23, %33 : vector<1x64xf32>
        %35 = arith.subf %34, %16 : vector<1x64xf32>
        %cst_14 = arith.constant 0.00999999977 : f32
        %36 = vector.broadcast %cst_14 : f32 to vector<1x64xf32>
        %37 = arith.addf %35, %36 : vector<1x64xf32>
        %38 = arith.subf %16, %23 : vector<1x64xf32>
        %cst_15 = arith.constant 0.00999999977 : f32
        %39 = vector.broadcast %cst_15 : f32 to vector<1x64xf32>
        %40 = arith.addf %38, %39 : vector<1x64xf32>
        %cst_16 = arith.constant 1.000000e+00 : f32
        %41 = vector.broadcast %cst_16 : f32 to vector<1x64xf32>
        %42 = arith.addf %23, %41 : vector<1x64xf32>
        %cst_17 = arith.constant 1.000000e+00 : f32
        %43 = vector.broadcast %cst_17 : f32 to vector<1x64xf32>
        %44 = arith.addf %23, %43 : vector<1x64xf32>
        %45 = tpu.concatenate %23, %23, %42, %44 in 1 : vector<1x64xf32>, vector<1x64xf32>, vector<1x64xf32>, vector<1x64xf32> -> vector<1x256xf32>
        %cst_18 = arith.constant 1.000000e+00 : f32
        %46 = vector.broadcast %cst_18 : f32 to vector<1x64xf32>
        %47 = arith.addf %24, %46 : vector<1x64xf32>
        %cst_19 = arith.constant 1.000000e+00 : f32
        %48 = vector.broadcast %cst_19 : f32 to vector<1x64xf32>
        %49 = arith.addf %24, %48 : vector<1x64xf32>
        %50 = tpu.concatenate %24, %47, %24, %49 in 1 : vector<1x64xf32>, vector<1x64xf32>, vector<1x64xf32>, vector<1x64xf32> -> vector<1x256xf32>
        %51 = arith.mulf %29, %37 : vector<1x64xf32>
        %52 = arith.mulf %32, %37 : vector<1x64xf32>
        %53 = arith.mulf %29, %40 : vector<1x64xf32>
        %54 = arith.mulf %32, %40 : vector<1x64xf32>
        %55 = tpu.concatenate %51, %52, %53, %54 in 1 : vector<1x64xf32>, vector<1x64xf32>, vector<1x64xf32>, vector<1x64xf32> -> vector<1x256xf32>
        %56 = tpu.concatenate %22, %22, %22, %22 in 1 : vector<1x64xf32>, vector<1x64xf32>, vector<1x64xf32>, vector<1x64xf32> -> vector<1x256xf32>
        %cst_20 = arith.constant 0.000000e+00 : f32
        %57 = vector.broadcast %cst_20 : f32 to vector<1x256xf32>
        %58 = arith.cmpf oge, %45, %57 : vector<1x256xf32>
        %cst_21 = arith.constant 1.500000e+01 : f32
        %59 = vector.broadcast %cst_21 : f32 to vector<1x256xf32>
        %60 = arith.cmpf ole, %45, %59 : vector<1x256xf32>
        %61 = arith.andi %58, %60 : vector<1x256xi1>
        %cst_22 = arith.constant 0.000000e+00 : f32
        %62 = vector.broadcast %cst_22 : f32 to vector<1x256xf32>
        %63 = arith.cmpf oge, %50, %62 : vector<1x256xf32>
        %64 = arith.andi %61, %63 : vector<1x256xi1>
        %cst_23 = arith.constant 3.100000e+01 : f32
        %65 = vector.broadcast %cst_23 : f32 to vector<1x256xf32>
        %66 = arith.cmpf ole, %50, %65 : vector<1x256xf32>
        %67 = arith.andi %64, %66 : vector<1x256xi1>
        %68 = arith.extui %67 : vector<1x256xi1> to vector<1x256xi32>
        %69 = arith.sitofp %68 : vector<1x256xi32> to vector<1x256xf32>
        %70 = arith.mulf %55, %69 : vector<1x256xf32>
        %71 = arith.mulf %70, %56 : vector<1x256xf32>
        %72 = vector.broadcast %71 : vector<1x256xf32> to vector<3x256xf32>
        %73 = arith.mulf %9, %72 : vector<3x256xf32>
        %74 = tpu.concatenate %73, %71 in 0 : vector<3x256xf32>, vector<1x256xf32> -> vector<4x256xf32>
        %75 = arith.index_cast %arg9 : i32 to index
        %c0_24 = arith.constant 0 : index
        %c0_25 = arith.constant 0 : index
        %76 = vector.load %arg6[%75, %c0_24, %c0_25] : memref<4x4x256xf32, #tpu.memory_space<vmem>>, vector<1x4x256xf32>
        %77 = vector.shape_cast %76 : vector<1x4x256xf32> to vector<4x256xf32>
        %78 = vector.shape_cast %74 : vector<4x256xf32> to vector<1x4x256xf32>
        tpu.vector_store %arg6[%75, %c0_24, %c0_25], %78 {strides = array<i32>} : memref<4x4x256xf32, #tpu.memory_space<vmem>>, vector<1x4x256xf32>,
        %79 = arith.index_cast %arg9 : i32 to index
        %c0_26 = arith.constant 0 : index
        %c0_27 = arith.constant 0 : index
        %80 = vector.load %arg7[%79, %c0_26, %c0_27] : memref<4x1x256xf32, #tpu.memory_space<vmem>>, vector<1x1x256xf32>
        %81 = vector.shape_cast %80 : vector<1x1x256xf32> to vector<1x256xf32>
        %82 = vector.shape_cast %50 : vector<1x256xf32> to vector<1x1x256xf32>
        tpu.vector_store %arg7[%79, %c0_26, %c0_27], %82 {strides = array<i32>} : memref<4x1x256xf32, #tpu.memory_space<vmem>>, vector<1x1x256xf32>,
        %83 = vector.broadcast %45 : vector<1x256xf32> to vector<16x256xf32>
        %84 = arith.cmpf oeq, %83, %11 : vector<16x256xf32>
        %85 = arith.extui %84 : vector<16x256xi1> to vector<16x256xi32>
        %86 = arith.sitofp %85 : vector<16x256xi32> to vector<16x256xf32>
        %87 = arith.index_cast %arg9 : i32 to index
        %c0_28 = arith.constant 0 : index
        %c0_29 = arith.constant 0 : index
        %88 = vector.load %arg8[%87, %c0_28, %c0_29] : memref<4x16x256xf32, #tpu.memory_space<vmem>>, vector<1x16x256xf32>
        %89 = vector.shape_cast %88 : vector<1x16x256xf32> to vector<16x256xf32>
        %90 = vector.shape_cast %86 : vector<16x256xf32> to vector<1x16x256xf32>
        tpu.vector_store %arg8[%87, %c0_28, %c0_29], %90 {strides = array<i32>} : memref<4x16x256xf32, #tpu.memory_space<vmem>>, vector<1x16x256xf32>,
      }
      %c4_i32_7 = arith.constant 4 : i32
    } else {
    }
    %3 = tpu.iota {dimensions = array<i32: 0>} : vector<32x256xi32>
    %c32_i32 = arith.constant 32 : i32
    %4 = arith.muli %arg1, %c32_i32 : i32
    %5 = vector.broadcast %4 : i32 to vector<32x256xi32>
    %6 = arith.addi %3, %5 : vector<32x256xi32>
    %7 = arith.sitofp %6 : vector<32x256xi32> to vector<32x256xf32>
    %c0_i32_1 = arith.constant 0 : i32
    %c4_i32 = arith.constant 4 : i32
    %8 = arith.addi %c0_i32_1, %c4_i32 : i32
    %c1_i32 = arith.constant 1 : i32
    scf.for %arg9 = %c0_i32_1 to %8 step %c1_i32  : i32 {
      %9 = arith.index_cast %arg9 : i32 to index
      %c0 = arith.constant 0 : index
      %c0_3 = arith.constant 0 : index
      %10 = vector.load %arg6[%9, %c0, %c0_3] : memref<4x4x256xf32, #tpu.memory_space<vmem>>, vector<1x4x256xf32>
      %11 = vector.shape_cast %10 : vector<1x4x256xf32> to vector<4x256xf32>
      %12 = arith.index_cast %arg9 : i32 to index
      %c0_4 = arith.constant 0 : index
      %c0_5 = arith.constant 0 : index
      %13 = vector.load %arg7[%12, %c0_4, %c0_5] : memref<4x1x256xf32, #tpu.memory_space<vmem>>, vector<1x1x256xf32>
      %14 = vector.shape_cast %13 : vector<1x1x256xf32> to vector<1x256xf32>
      %15 = arith.index_cast %arg9 : i32 to index
      %c0_6 = arith.constant 0 : index
      %c0_7 = arith.constant 0 : index
      %16 = vector.load %arg8[%15, %c0_6, %c0_7] : memref<4x16x256xf32, #tpu.memory_space<vmem>>, vector<1x16x256xf32>
      %17 = vector.shape_cast %16 : vector<1x16x256xf32> to vector<16x256xf32>
      %18 = vector.broadcast %14 : vector<1x256xf32> to vector<32x256xf32>
      %19 = arith.cmpf oeq, %18, %7 : vector<32x256xf32>
      %20 = arith.extui %19 : vector<32x256xi1> to vector<32x256xi32>
      %21 = arith.sitofp %20 : vector<32x256xi32> to vector<32x256xf32>
      %22 = vector.extract_strided_slice %11 {offsets = [0, 0], sizes = [1, 256], strides = [1, 1]} : vector<4x256xf32> to vector<1x256xf32>
      %23 = vector.broadcast %22 : vector<1x256xf32> to vector<32x256xf32>
      %24 = arith.mulf %23, %21 : vector<32x256xf32>
      %cst = arith.constant dense<0.000000e+00> : vector<32x16xf32>
      %25 = tpu.matmul %24, %17, %cst {dimension_numbers = #tpu.dot_dimension_numbers<[1], [1], [0], [0], [0, 0, 1, 0], [], []>} : vector<32x256xf32>, vector<16x256xf32>, vector<32x16xf32> -> vector<32x16xf32>
      %26 = vector.extract_strided_slice %11 {offsets = [1, 0], sizes = [1, 256], strides = [1, 1]} : vector<4x256xf32> to vector<1x256xf32>
      %27 = vector.broadcast %26 : vector<1x256xf32> to vector<32x256xf32>
      %28 = arith.mulf %27, %21 : vector<32x256xf32>
      %cst_8 = arith.constant dense<0.000000e+00> : vector<32x16xf32>
      %29 = tpu.matmul %28, %17, %cst_8 {dimension_numbers = #tpu.dot_dimension_numbers<[1], [1], [0], [0], [0, 0, 1, 0], [], []>} : vector<32x256xf32>, vector<16x256xf32>, vector<32x16xf32> -> vector<32x16xf32>
      %30 = vector.extract_strided_slice %11 {offsets = [2, 0], sizes = [1, 256], strides = [1, 1]} : vector<4x256xf32> to vector<1x256xf32>
      %31 = vector.broadcast %30 : vector<1x256xf32> to vector<32x256xf32>
      %32 = arith.mulf %31, %21 : vector<32x256xf32>
      %cst_9 = arith.constant dense<0.000000e+00> : vector<32x16xf32>
      %33 = tpu.matmul %32, %17, %cst_9 {dimension_numbers = #tpu.dot_dimension_numbers<[1], [1], [0], [0], [0, 0, 1, 0], [], []>} : vector<32x256xf32>, vector<16x256xf32>, vector<32x16xf32> -> vector<32x16xf32>
      %34 = vector.extract_strided_slice %11 {offsets = [3, 0], sizes = [1, 256], strides = [1, 1]} : vector<4x256xf32> to vector<1x256xf32>
      %35 = vector.broadcast %34 : vector<1x256xf32> to vector<32x256xf32>
      %36 = arith.mulf %35, %21 : vector<32x256xf32>
      %cst_10 = arith.constant dense<0.000000e+00> : vector<32x16xf32>
      %37 = tpu.matmul %36, %17, %cst_10 {dimension_numbers = #tpu.dot_dimension_numbers<[1], [1], [0], [0], [0, 0, 1, 0], [], []>} : vector<32x256xf32>, vector<16x256xf32>, vector<32x16xf32> -> vector<32x16xf32>
      %cst_11 = arith.constant 0.000000e+00 : f32
      %38 = vector.broadcast %cst_11 : f32 to vector<32x16xf32>
      %39 = arith.cmpf ogt, %37, %38 : vector<32x16xf32>
      %cst_12 = arith.constant 1.000000e+00 : f32
      %40 = vector.broadcast %cst_12 : f32 to vector<32x16xf32>
      %41 = arith.select %39, %37, %40 : vector<32x16xi1>, vector<32x16xf32>
      %cst_13 = arith.constant 1.000000e+00 : f32
      %42 = vector.broadcast %cst_13 : f32 to vector<32x16xf32>
      %43 = arith.divf %42, %41 : vector<32x16xf32>
      %cst_14 = arith.constant 7.500000e-01 : f32
      %cst_15 = arith.constant 0.000000e+00 : f32
      %44 = vector.broadcast %cst_14 : f32 to vector<32x16xf32>
      %45 = vector.broadcast %cst_15 : f32 to vector<32x16xf32>
      %46 = arith.select %39, %44, %45 : vector<32x16xi1>, vector<32x16xf32>
      %47 = arith.mulf %25, %43 : vector<32x16xf32>
      %48 = arith.mulf %29, %43 : vector<32x16xf32>
      %49 = arith.mulf %33, %43 : vector<32x16xf32>
      %50 = vector.shape_cast %47 : vector<32x16xf32> to vector<1x32x16xf32>
      %51 = vector.shape_cast %48 : vector<32x16xf32> to vector<1x32x16xf32>
      %52 = vector.shape_cast %49 : vector<32x16xf32> to vector<1x32x16xf32>
      %53 = tpu.concatenate %50, %51, %52 in 0 : vector<1x32x16xf32>, vector<1x32x16xf32>, vector<1x32x16xf32> -> vector<3x32x16xf32>
      %54 = arith.index_cast %arg9 : i32 to index
      %c0_16 = arith.constant 0 : index
      %c0_17 = arith.constant 0 : index
      %c0_18 = arith.constant 0 : index
      %55 = vector.load %arg4[%54, %c0_16, %c0_17, %c0_18] : memref<4x3x32x16xf32, #tpu.memory_space<vmem>>, vector<1x3x32x16xf32>
      %56 = vector.shape_cast %55 : vector<1x3x32x16xf32> to vector<3x32x16xf32>
      %57 = vector.shape_cast %46 : vector<32x16xf32> to vector<1x32x16xf32>
      %58 = arith.subf %53, %56 : vector<3x32x16xf32>
      %59 = vector.broadcast %57 : vector<1x32x16xf32> to vector<3x32x16xf32>
      %60 = arith.mulf %59, %58 : vector<3x32x16xf32>
      %61 = arith.addf %56, %60 : vector<3x32x16xf32>
      %62 = arith.index_cast %arg9 : i32 to index
      %c0_19 = arith.constant 0 : index
      %c0_20 = arith.constant 0 : index
      %c0_21 = arith.constant 0 : index
      %63 = vector.load %arg5[%62, %c0_19, %c0_20, %c0_21] : memref<4x3x32x16xf32, #tpu.memory_space<vmem>>, vector<1x3x32x16xf32>
      %64 = vector.shape_cast %63 : vector<1x3x32x16xf32> to vector<3x32x16xf32>
      %65 = vector.shape_cast %61 : vector<3x32x16xf32> to vector<1x3x32x16xf32>
      tpu.vector_store %arg5[%62, %c0_19, %c0_20, %c0_21], %65 {strides = array<i32>} : memref<4x3x32x16xf32, #tpu.memory_space<vmem>>, vector<1x3x32x16xf32>,
    }
    %c4_i32_2 = arith.constant 4 : i32
    return
  }
  func.func @transform_0(%arg0: i32, %arg1: i32) -> (i32, i32, i32) {
    %c0_i32 = arith.constant 0 : i32
    %c0_i32_0 = arith.constant 0 : i32
    %c0_i32_1 = arith.constant 0 : i32
    return %arg0, %c0_i32, %c0_i32_0 : i32, i32, i32
  }
  func.func @transform_1(%arg0: i32, %arg1: i32) -> (i32, i32) {
    %c0_i32 = arith.constant 0 : i32
    %c0_i32_0 = arith.constant 0 : i32
    %c0_i32_1 = arith.constant 0 : i32
    return %c0_i32, %c0_i32_0 : i32, i32
  }
  func.func @transform_2(%arg0: i32, %arg1: i32) -> (i32, i32, i32, i32) {
    %c0_i32 = arith.constant 0 : i32
    %c0_i32_0 = arith.constant 0 : i32
    %c0_i32_1 = arith.constant 0 : i32
    return %arg0, %c0_i32, %arg1, %c0_i32_0 : i32, i32, i32, i32
  }
  func.func @transform_3(%arg0: i32, %arg1: i32) -> (i32, i32, i32, i32) {
    %c0_i32 = arith.constant 0 : i32
    %c0_i32_0 = arith.constant 0 : i32
    %c0_i32_1 = arith.constant 0 : i32
    return %arg0, %c0_i32, %arg1, %c0_i32_0 : i32, i32, i32, i32
  }
}

</mosaic_0001>

<bundles_post_ra>
// kernel: tpu_custom_call.1
= control target key start
LH: loop header
LB: loop body
LE: loop exit
PB: predicated region body
PF: predicated region fallthrough
CT: control target
= control target key end

     0   :  { %s1338_s12 = smov 0   ;;  %s1340_s13 = smov 0   ;;  %s1636_s0 = inlined_call_operand.vmem [shape: f32[8,3,64], index: 0, kind: input, shape index: {}]   ;;  %s1637_s1 = inlined_call_operand.vmem [shape: f32[3,256], index: 1, kind: input, shape index: {}]   ;;  %s1638_s2 = inlined_call_operand.vmem [shape: f32[8,3,32,16], index: 2, kind: input, shape index: {}]   ;;  %s1639_s3 = inlined_call_operand.vmem [shape: f32[8,3,32,16], index: 3, kind: output, shape index: {}]  }
   0x1   :  { %s1342_s14 = smov 0  }
   0x2 LB: > { %s25_s15 = sadd.s32 1, %s1299_s13  ;;  %p1167_p0 = scmp.ge.s32.totalorder %s1303_s14, 1  ;;  %s1303_s14 = sphi %s1342_s14, %s13_s14   ;;  %s1299_s13 = sphi %s1340_s13, %s1647_s13   ;;  %s1295_s12 = sphi %s1338_s12, %s1646_s12  }
   0x3   : > { %p27_p1 = scmp.ge.s32.totalorder %s25_s15, 2  ;;  %p171_p2 = scmp.lt.s32.totalorder %s1303_s14, 3 }
   0x5   : > { %s1649_s15 = smov (%p27_p1, %s25_s15), 0  ;;  %p172_p3 = pnand %p1167_p0, %p171_p2 }
   0x6   : > { %s1168_s16 = sshll.u32 (!%p172_p3), %s1295_s12, 2  ;;  %v1359_v0 = vld [vmem:[%s1637_s1] sm:$0x77] (!%p172_p3)  ;;  %v245_v1 = vlaneseq (!%p172_p3)  ;;  %s1385_s30 = smov (!%p172_p3), 0  }
   0x7   : > { %175 = sbr.rel (%p172_p3) target bundleno = 448 (0x1c0), region = 32  ;;  %p211_p4 = scmp.lt.s32.totalorder (!%p172_p3), %s1168_s16, 7 }
   0x8   : > { %v1362_v2 = vshrl.u32 (!%p172_p3), %v245_v1, 7 }
   0xa   : > { %v247_v3 = vadd.s32 (!%p172_p3), 8, %v1362_v2  ;;  %v1366_v4 = vcvt.s32.f32 (!%p172_p3), %v1362_v2 }
   0xc   : > { %v1373_v5 = vcvt.s32.f32 (!%p172_p3), %v247_v3 }
   0xe   : > { %s1651_s16 = smov (!%p211_p4, %s1168_s16), 7 }
   0xf   : > { %s1169_s19 = sshll.u32 %s1651_s16, 2  ;;  %s1219_s20 = smul.u32 96, %s1651_s16 }
  0x10   : > { %s1371_s23 = scalar_lea.vmem %s1636_s0, %s1169_s19 }
  0x11   : > { %s1378_s26 = scalar_lea.vmem %s1638_s2, %s1219_s20  ;;  %s1383_s29 = scalar_lea.vmem %s1639_s3, %s1219_s20 }
  0x12 LB: >> { %s1174_s4 = sshll.u32 %s1307_s30, 2  ;;  %s1313_s6 = smov 64   ;;  %v1314_v16 = vmov 0.0   ;;  %v1315_v21 = vmov 1966171168   ;;  %vm276_vm1 = vcmask 523264   ;;  %s1307_s30 = sphi %s1385_s30, %s255_s30  }
  0x13   : >> { %s257_s5 = scalar_lea.vmem %s1371_s23, %s1174_s4  ;;  %v376_v22 = vunpack.c.l.s4 %v1315_v21  ;;  %v1398_v24 = vsub.s32 0, %v1362_v2  ;;  %s1200_s7 = sshll.u32 %s1307_s30, 5  ;;  %v1316_v29 = vmov 0   ;;  %vm394_vm14 = vcmp.lt.s32.totalorder %v245_v1, 256 }
  0x14   : >> { %v258_v6 = vld [vmem:[%s257_s5] sm:$0x7]  ;;  %s1178_s8 = sshll.u32 %s1307_s30, 1  ;;  %s418_s9 = scalar_lea.vmem [#allocation4], %s1200_s7  ;;  %v1454_v61 = vsub.s32 1, %v1362_v2 }
  0x15   : >> { %v262_v7 = vfloor.f32 %v258_v6  ;;  %vm259_vm0 = vcmp.ne.f32.partialorder %v258_v6, 0.0  ;;  %v377_v23 = vunpack.c.0.s8 %v376_v22  ;;  %s391_s10 = scalar_lea.vmem [#allocation3], %s1178_s8  ;;  %s1199_s11 = sshll.u32 %s1307_s30, 3 }
  0x16   : >> { %v1175_v17 = vsel %vm259_vm0, 1.0, %v1314_v16  ;;  %s371_s12 = scalar_lea.vmem [#allocation2], %s1199_s11  ;;  %s255_s30 = sadd.s32 1, %s1307_s30  }
  0x17   : >> { %v263_v8 = vadd.f32 1.0, %v262_v7  ;;  %v266_v9 = vsub.f32 %v258_v6, %v262_v7  ;;  %v380_v26 = vsub.s32 %v377_v23, %v1362_v2  ;;  %p252_p5 = scmp.ge.s32.totalorder %s255_s30, 4  }
  0x18   : > { %s1471_s16 = smov (%p252_p5), 0  }
  0x19   : >> { %273 = vrot.lane.b32.xlu0 %v263_v8, %s1313_s6  ;;  %v264_v10 = vsub.f32 %v263_v8, %v258_v6  ;;  %v267_v11 = vadd.f32 0.01, %v266_v9 }
  0x1b   : >> { %v265_v12 = vadd.f32 0.01, %v264_v10  ;;  %v286_v13 = vrot.slane %v267_v11, 7 }
  0x1d   : >> { %269 = vrot.lane.b32.xlu0 %v262_v7, %s1313_s6  ;;  %v281_v14 = vrot.slane %v265_v12, 7  ;;  %v1392_v15 = vmul.f32 %v286_v13, %v265_v12  ;;  %v289_v20 = vmul.f32 %v286_v13, %v267_v11 }
  0x1f   : >> { %v284_v18 = vmul.f32 %v281_v14, %v267_v11  ;;  %v1395_v19 = vmul.f32 %v281_v14, %v265_v12 }
  0x21   : >> { %291 = vrot.lane.b32.xlu1 %v284_v18, %s1313_s6  ;;  %301 = vrot.lane.b32.xlu0 %v1175_v17, %s1313_s6 }
  0x25   : >> { %295 = vrot.lane.b32.xlu1 %v289_v20, %s1313_s6 }
  0x8b   : >> { %v274_v25 = vpop.permute.xlu0 %273 }
  0x8c   : >> { %v278_v27 = vsel %vm276_vm1, %v263_v8, %v274_v25  ;;  %v279_v28 = vsel %vm276_vm1, %v262_v7, %v274_v25 }
  0x8d   : >> { %vm306_vm2 = vcmp.ge.f32.partialorder %v278_v27, 0.0  ;;  %vm308_vm3 = vcmp.le.f32.partialorder %v278_v27, 15.0  ;;  %vm311_vm4 = vcmp.ge.f32.partialorder %v279_v28, 0.0  ;;  %vm317_vm5 = vcmp.le.f32.partialorder %v279_v28, 31.0 }
  0x8e   : >> { %v312_v30 = vsel %vm311_vm4, 1, %v1316_v29  ;;  %v318_v31 = vsel %vm317_vm5, 1, %v1316_v29  ;;  %v374_v32 = vcombine.low %v279_v28, %v279_v28  ;;  %v404_v33 = vrot.slane %v278_v27, %v1398_v24  ;;  %vm1411_vm8 = vmand %vm306_vm2, %vm308_vm3 }
  0x8f   : >> { %v313_v34 = vrot.slane %v312_v30, 1  ;;  %v319_v35 = vrot.slane %v318_v31, 1  ;;  %v270_v36 = vpop.permute.xlu0 %269 }
  0x90   : >> { %v381_v37 = vrot.slane %v374_v32, %v380_v26  ;;  %vm406_vm6 = vcmp.eq.f32.partialorder %v404_v33, %v1366_v4  ;;  %vm408_vm7 = vcmp.eq.f32.partialorder %v404_v33, %v1373_v5  ;;  %v277_v38 = vsel %vm276_vm1, %v262_v7, %v270_v36 }
  0x91   : >> { %vm1415_vm9 = vcmp.ne.s32.totalorder %v313_v34, 0  ;;  %vm1419_vm10 = vcmp.ne.s32.totalorder %v319_v35, 0  ;;  %v1181_v42 = vsel %vm406_vm6, 1.0, %v1314_v16  ;;  %v1183_v43 = vsel %vm408_vm7, 1.0, %v1314_v16 }
  0x92   : >> { %vm316_vm11 = vmand %vm1411_vm8, %vm1415_vm9  ;;  %v382_v44 = vcombine.high %v381_v37, %v381_v37  ;;  %420 = vst [vmem:[%s418_s9 + $0x8] sm:$0xff] %v1181_v42  ;;  %vm305_vm12 = vcmp.ge.f32.partialorder %v277_v38, 0.0  ;;  %vm307_vm13 = vcmp.le.f32.partialorder %v277_v38, 15.0  ;;  %v400_v45 = vrot.slane %v277_v38, %v1398_v24 }
  0x93   : >> { %422 = vst [vmem:[%s418_s9 + $0x18] sm:$0xff] %v1183_v43  ;;  %vm309_vm15 = vmand %vm305_vm12, %vm307_vm13  ;;  %v292_v46 = vpop.permute.xlu1 %291  ;;  %v302_v47 = vpop.permute.xlu0 %301  ;;  %vm362_vm6 = vcmask 1042432  }
  0x94   : >> { %v389_v48 = vrot.slane %v382_v44, %v380_v26  ;;  %vm315_vm0 = vmand %vm309_vm15, %vm1415_vm9  ;;  %vm405_vm2 = vcmp.eq.f32.partialorder %v400_v45, %v1366_v4  ;;  %vm407_vm3 = vcmp.eq.f32.partialorder %v400_v45, %v1373_v5  ;;  %v304_v51 = vsel %vm276_vm1, %v1175_v17, %v302_v47 }
  0x95   : >> { %v1180_v49 = vsel %vm405_vm2, 1.0, %v1314_v16  ;;  %v1182_v50 = vsel %vm407_vm3, 1.0, %v1314_v16  ;;  %vm321_vm4 = vmand %vm315_vm0, %vm1419_vm10  ;;  %v336_v54 = vrot.slane %v304_v51, 1  ;;  %v298_v57 = vsel %vm276_vm1, %v1395_v19, %v292_v46 }
  0x96   : >> { %396 = vst.msk [vmem:[%s391_s10] sm:$0x3] %vm394_vm14, %v389_v48  ;;  %419 = vst [vmem:[%s418_s9] sm:$0xff] %v1180_v49  ;;  %v1176_v52 = vsel %vm321_vm4, 1.0, %v1314_v16  ;;  %v1467_v17 = vadd.s32 (%p252_p5), 24, %v1362_v2 }
  0x97   : >> { %421 = vst [vmem:[%s418_s9 + $0x10] sm:$0xff] %v1182_v50  ;;  %vm322_vm5 = vmand %vm316_vm11, %vm1419_vm10  ;;  %v329_v53 = vrot.slane %v1176_v52, 7  ;;  %v296_v56 = vpop.permute.xlu1 %295 }
  0x98   : >> { %v1177_v55 = vsel %vm322_vm5, 1.0, %v1314_v16  ;;  %v299_v59 = vsel %vm276_vm1, %v1392_v15, %v296_v56  ;;  %v1464_v16 = vadd.s32 (%p252_p5), 16, %v1362_v2  ;;  %v437_v19 = vcvt.s32.f32 (%p252_p5), %v1467_v17 }
  0x99   : >> { %v330_v58 = vrot.slane %v1177_v55, 7  ;;  %v333_v60 = vmul.f32 %v329_v53, %v298_v57 }
  0x9a   : > { %v436_v18 = vcvt.s32.f32 (%p252_p5), %v1464_v16 }
  0x9b   : >> { %v334_v62 = vmul.f32 %v330_v58, %v299_v59  ;;  %v338_v63 = vmul.f32 %v336_v54, %v333_v60 }
  0x9d   : >> { %v339_v3 = vmul.f32 %v336_v54, %v334_v62  ;;  %v343_v6 = vrot.slane %v338_v63, %v1454_v61  ;;  %v358_v9 = vrot.slane %v338_v63, 6 }
  0x9f   : >> { %v347_v7 = vrot.slane %v339_v3, %v1454_v61  ;;  %v359_v12 = vrot.slane %v339_v3, 6 }
  0xa1   : >> { %v350_v8 = vcombine.low %v343_v6, %v347_v7 }
  0xa3   : >> { %v352_v10 = vmul.f32 %v350_v8, %v1359_v0 }
  0xa4   : > { %254 = sbr.rel (!%p252_p5) target bundleno = 18 (0x12), region = 92 }
  0xa5   : >> { %v354_v11 = vcombine.high %v352_v10, %v352_v10  ;;  %v363_v13 = vsel %vm362_vm6, %v352_v10, %v358_v9 }
  0xa7   : >> { %v364_v14 = vsel %vm362_vm6, %v354_v11, %v359_v12 }
  0xa8   : >> { %v367_v15 = vcombine.low %v363_v13, %v364_v14 }
  0xaa   : >> { %372 = vst [vmem:[%s371_s12] sm:$0xff] %v367_v15 }
  0xab LB: >> { %v610_v0 = vsub.s32 5, %v1362_v2  ;;  %v499_v1 = vsub.s32 4, %v1362_v2  ;;  %s1201_s17 = sshll.u32 %s1311_s16, 3  ;;  %s1202_s18 = sshll.u32 %s1311_s16, 5  ;;  %v1317_v38 = vmov 0.0   ;;  %v832_v45 = vsub.s32 7, %v1362_v2  ;;  %s1311_s16 = sphi %s1471_s16, %s443_s16  }
  0xac   : >> { %s446_s19 = scalar_lea.vmem [#allocation2], %s1201_s17  ;;  %s452_s20 = scalar_lea.vmem [#allocation4], %s1202_s18  ;;  %v828_v50 = vsub.s32 3, %v1362_v2  ;;  %v721_v54 = vsub.s32 6, %v1362_v2  ;;  %v717_v60 = vsub.s32 2, %v1362_v2  ;;  %vm1020_vm3 = vcmask 130048  }
  0xad   : >> { %v454_v21 = vld [vmem:[%s452_s20 + $0x8] sm:$0xff]  ;;  %v456_v22 = vld [vmem:[%s452_s20 + $0x18] sm:$0xff]  ;;  %s1185_s21 = sshll.u32 %s1311_s16, 1  ;;  %v453_v25 = vld [vmem:[%s452_s20] sm:$0xff]  ;;  %s969_s23 = smul.u32 96, %s1311_s16 }
  0xae   : >> { %v1203_v23 = vpack.c.bf16 %v456_v22, %v454_v21  ;;  %v455_v26 = vld [vmem:[%s452_s20 + $0x10] sm:$0xff]  ;;  %s448_s22 = scalar_lea.vmem [#allocation3], %s1185_s21  ;;  %s443_s16 = sadd.s32 1, %s1311_s16  }
  0xaf   : >> { %v1205_v30 = vpack.c.bf16 %v455_v26, %v453_v25  ;;  %v449_v31 = vld [vmem:[%s448_s22] sm:$0x3]  ;;  %s1558_s24 = scalar_lea.vmem %s1378_s26, %s969_s23  ;;  %s1580_s25 = scalar_lea.vmem %s1383_s29, %s969_s23 }
  0xb0   : >> { %1208 = vmatprep.subr.bf16.mxu1 %v1203_v23  ;;  %v461_v33 = vrot.slane %v449_v31, %v1398_v24  ;;  %v465_v34 = vrot.slane %v449_v31, %v1454_v61  ;;  %1204 = vmatprep.subr.bf16.mxu0 %v1203_v23  ;;  %p440_p6 = scmp.ge.s32.totalorder %s443_s16, 4  }
  0xb1   : >> { %v1480_v20 = vld [vmem:[%s446_s19] sm:$0xff]  ;;  %1210 = vmatpush1.bf16.xpose.msra.mxu1 %v1205_v30  ;;  %1206 = vmatpush1.bf16.xpose.msra.mxu0 %v1205_v30 }
  0xb2   : >> { %v611_v27 = vrot.slane %v1480_v20, %v610_v0  ;;  %v607_v28 = vrot.slane %v1480_v20, %v1454_v61  ;;  %v500_v29 = vrot.slane %v1480_v20, %v499_v1  ;;  %v496_v32 = vrot.slane %v1480_v20, %v1398_v24  ;;  %1216 = vmatprep.subr.bf16.mxu1 %v1203_v23 }
  0xb3   : >> { %vm469_vm1 = vcmp.eq.f32.partialorder %v465_v34, %v1366_v4  ;;  %vm468_vm7 = vcmp.eq.f32.partialorder %v461_v33, %v1366_v4  ;;  %vm471_vm8 = vcmp.eq.f32.partialorder %v465_v34, %v1373_v5  ;;  %vm470_vm9 = vcmp.eq.f32.partialorder %v461_v33, %v1373_v5  ;;  %1212 = vmatprep.subr.bf16.mxu0 %v1203_v23 }
  0xb4   : >> { %v621_v35 = vrot.slane %v611_v27, %v1454_v61  ;;  %v617_v36 = vrot.slane %v607_v28, %v1454_v61  ;;  %v510_v37 = vrot.slane %v500_v29, %v1398_v24  ;;  %v1190_v39 = vsel %vm469_vm1, 1.0, %v1317_v38 }
  0xb5   : >> { %v1500_v40 = vsel %vm468_vm7, 1.0, %v1317_v38  ;;  %v1503_v41 = vsel %vm471_vm8, 1.0, %v1317_v38  ;;  %v506_v44 = vrot.slane %v496_v32, %v1398_v24  ;;  %v1510_v47 = vsel %vm470_vm9, 1.0, %v1317_v38 }
  0xb6   : >> { %v623_v42 = vmul.f32 %v1190_v39, %v621_v35  ;;  %v622_v43 = vmul.f32 %v1500_v40, %v617_v36  ;;  %v625_v46 = vmul.f32 %v1503_v41, %v621_v35  ;;  %vm473_vm10 = vcmp.eq.f32.partialorder %v465_v34, %v436_v18 }
  0xb7   : >> { %v512_v48 = vmul.f32 %v1190_v39, %v510_v37  ;;  %v1194_v49 = vsel %vm473_vm10, 1.0, %v1317_v38  ;;  %vm472_vm11 = vcmp.eq.f32.partialorder %v461_v33, %v436_v18  ;;  %vm475_vm12 = vcmp.eq.f32.partialorder %v465_v34, %v437_v19 }
  0xb8   : >> { %694 = vmatprep.mubr.f32.mxu1 %v623_v42  ;;  %v624_v51 = vmul.f32 %v1510_v47, %v617_v36  ;;  %v511_v52 = vmul.f32 %v1500_v40, %v506_v44  ;;  %v514_v53 = vmul.f32 %v1503_v41, %v510_v37  ;;  %v627_v55 = vmul.f32 %v1194_v49, %v621_v35 }
  0xb9   : >> { %583 = vmatprep.mubr.f32.mxu0 %v512_v48  ;;  %695 = vmatmul.mubr.f32.vlgmr.msra.gmra.mrb[0].mxu1 %v622_v43  ;;  %v1193_v56 = vsel %vm472_vm11, 1.0, %v1317_v38  ;;  %v833_v57 = vrot.slane %v1480_v20, %v832_v45  ;;  %v1196_v58 = vsel %vm475_vm12, 1.0, %v1317_v38  ;;  %vm474_vm13 = vcmp.eq.f32.partialorder %v461_v33, %v437_v19 }
  0xba   : >> { %1218 = vmatpush1.bf16.xpose.msra.mxu1 %v1205_v30  ;;  %699 = vmatprep.mubr.f32.mxu1 %v625_v46  ;;  %v513_v59 = vmul.f32 %v1510_v47, %v506_v44  ;;  %v516_v62 = vmul.f32 %v1194_v49, %v510_v37  ;;  %v626_v63 = vmul.f32 %v1193_v56, %v617_v36  ;;  %v1195_v8 = vsel %vm474_vm13, 1.0, %v1317_v38 }
  0xbb   : >> { %584 = vmatmul.mubr.f32.vlgmr.msra.gmra.mrb[0].mxu0 %v511_v52  ;;  %v829_v3 = vrot.slane %v1480_v20, %v828_v50  ;;  %v722_v6 = vrot.slane %v1480_v20, %v721_v54  ;;  %v629_v7 = vmul.f32 %v1196_v58, %v621_v35  ;;  %v843_v9 = vrot.slane %v833_v57, %v828_v50 }
  0xbc   : >> { %1214 = vmatpush1.bf16.xpose.msra.mxu0 %v1205_v30  ;;  %588 = vmatprep.mubr.f32.mxu0 %v514_v53  ;;  %v515_v10 = vmul.f32 %v1193_v56, %v506_v44  ;;  %v718_v11 = vrot.slane %v1480_v20, %v717_v60  ;;  %v518_v12 = vmul.f32 %v1196_v58, %v510_v37 }
  0xbd   : >> { %700 = vmatmul.mubr.f32.gmra.mrb[2].mxu1 %v624_v51  ;;  %v732_v13 = vrot.slane %v722_v6, %v717_v60  ;;  %v628_v14 = vmul.f32 %v1195_v8, %v617_v36  ;;  %v839_v15 = vrot.slane %v829_v3, %v828_v50  ;;  %v845_v0 = vmul.f32 %v1190_v39, %v843_v9 }
  0xbe   : >> { %704 = vmatprep.mubr.f32.mxu1 %v627_v55  ;;  %v517_v1 = vmul.f32 %v1195_v8, %v506_v44  ;;  %v728_v21 = vrot.slane %v718_v11, %v717_v60  ;;  %v847_v25 = vmul.f32 %v1503_v41, %v843_v9  ;;  %v849_v28 = vmul.f32 %v1194_v49, %v843_v9 }
  0xbf   : >> { %589 = vmatmul.mubr.f32.gmra.mrb[2].mxu0 %v513_v59  ;;  %v734_v22 = vmul.f32 %v1190_v39, %v732_v13  ;;  %v844_v23 = vmul.f32 %v1500_v40, %v839_v15  ;;  %v736_v26 = vmul.f32 %v1503_v41, %v732_v13  ;;  %v846_v27 = vmul.f32 %v1510_v47, %v839_v15 }
  0xc0   : >> { %593 = vmatprep.mubr.f32.mxu0 %v516_v62  ;;  %v733_v20 = vmul.f32 %v1500_v40, %v728_v21  ;;  %v735_v29 = vmul.f32 %v1510_v47, %v728_v21  ;;  %v738_v30 = vmul.f32 %v1194_v49, %v732_v13  ;;  %v848_v31 = vmul.f32 %v1193_v56, %v839_v15 }
  0xc1   : >> { %705 = vmatmul.mubr.f32.gmra.mrb[4].mxu1 %v626_v63  ;;  %v851_v32 = vmul.f32 %v1196_v58, %v843_v9  ;;  %v737_v33 = vmul.f32 %v1193_v56, %v728_v21  ;;  %v740_v34 = vmul.f32 %v1196_v58, %v732_v13  ;;  %v850_v35 = vmul.f32 %v1195_v8, %v839_v15  ;;  %v971_v13 = vld [vmem:[%s1558_s24] sm:$0xff] }
  0xc2   : >> { %709 = vmatprep.mubr.f32.mxu1 %v629_v7  ;;  %v739_v36 = vmul.f32 %v1195_v8, %v728_v21 }
  0xc3   : >> { %594 = vmatmul.mubr.f32.gmra.mrb[4].mxu0 %v515_v10 }
  0xc4   : >> { %598 = vmatprep.mubr.f32.mxu0 %v518_v12 }
  0xc5   : >> { %710 = vmatmul.mubr.f32.gmra.mrb[6].mxu1 %v628_v14  ;;  %v975_v14 = vld [vmem:[%s1558_s24 + $0x20] sm:$0xff] }
  0xc6   : >> { %916 = vmatprep.mubr.f32.mxu1 %v845_v0 }
  0xc7   : >> { %599 = vmatmul.mubr.f32.gmra.mrb[6].mxu0 %v517_v1 }
  0xc8   : >> { %805 = vmatprep.mubr.f32.mxu0 %v734_v22  ;;  %v979_v22 = vld [vmem:[%s1558_s24 + $0x40] sm:$0xff] }
  0xc9   : >> { %917 = vmatmul.mubr.f32.vlgmr.msra.gmra.mrb[8].mxu1 %v844_v23 }
  0xca   : >> { %921 = vmatprep.mubr.f32.mxu1 %v847_v25 }
  0xcb   : >> { %806 = vmatmul.mubr.f32.vlgmr.msra.gmra.mrb[8].mxu0 %v733_v20 }
  0xcc   : >> { %810 = vmatprep.mubr.f32.mxu0 %v736_v26 }
  0xcd   : >> { %922 = vmatmul.mubr.f32.gmra.mrb[10].mxu1 %v846_v27 }
  0xce   : >> { %926 = vmatprep.mubr.f32.mxu1 %v849_v28 }
  0xcf   : >> { %811 = vmatmul.mubr.f32.gmra.mrb[10].mxu0 %v735_v29 }
  0xd0   : >> { %815 = vmatprep.mubr.f32.mxu0 %v738_v30  ;;  %v972_v30 = vld [vmem:[%s1558_s24 + $0x8] sm:$0xff] }
  0xd1   : >> { %927 = vmatmul.mubr.f32.gmra.mrb[12].mxu1 %v848_v31  ;;  %v976_v31 = vld [vmem:[%s1558_s24 + $0x28] sm:$0xff] }
  0xd2   : >> { %931 = vmatprep.mubr.f32.mxu1 %v851_v32 }
  0xd3   : >> { %816 = vmatmul.mubr.f32.gmra.mrb[12].mxu0 %v737_v33 }
  0xd4   : >> { %820 = vmatprep.mubr.f32.mxu0 %v740_v34 }
  0xd5   : >> { %932 = vmatmul.mubr.f32.gmra.mrb[14].mxu1 %v850_v35 }
  0xd7   : >> { %821 = vmatmul.mubr.f32.gmra.mrb[14].mxu0 %v739_v36 }
 0x18c   : >> { %v696_v37 = vpop.f32.mrb[0].mxu1 }
 0x18d   : >> { %v698_v39 = vpop.f32.mrb[1].mxu1 }
 0x18e   : >> { %v585_v40 = vpop.f32.mrb[0].mxu0 }
 0x18f   : >> { %v587_v41 = vpop.f32.mrb[1].mxu0 }
 0x190   : >> { %v701_v42 = vpop.f32.mrb[2].mxu1 }
 0x191   : >> { %v703_v43 = vpop.f32.mrb[3].mxu1 }
 0x192   : >> { %v590_v44 = vpop.f32.mrb[2].mxu0 }
 0x193   : >> { %v592_v45 = vpop.f32.mrb[3].mxu0 }
 0x194   : >> { %v1541_v46 = vpop.f32.mrb[4].mxu1 }
 0x195   : >> { %v708_v47 = vpop.f32.mrb[5].mxu1 }
 0x196   : >> { %v1543_v48 = vpop.f32.mrb[4].mxu0 }
 0x197   : >> { %v597_v49 = vpop.f32.mrb[5].mxu0 }
 0x198   : >> { %v1545_v50 = vpop.f32.mrb[6].mxu1 }
 0x199   : >> { %v713_v51 = vpop.f32.mrb[7].mxu1 }
 0x19a   : >> { %v1547_v52 = vpop.f32.mrb[6].mxu0  ;;  %v977_v51 = vld [vmem:[%s1558_s24 + $0x30] sm:$0xff] }
 0x19b   : >> { %v602_v53 = vpop.f32.mrb[7].mxu0 }
 0x19c   : >> { %v918_v54 = vpop.f32.mrb[8].mxu1 }
 0x19d   : >> { %vm937_vm14 = vcmp.gt.f32.partialorder %v918_v54, 0.0  ;;  %v920_v55 = vpop.f32.mrb[9].mxu1 }
 0x19e   : >> { %v941_v56 = vsel %vm937_vm14, %v918_v54, 1.0  ;;  %v807_v57 = vpop.f32.mrb[8].mxu0  ;;  %v953_v29 = vsel %vm937_vm14, 0.75, %v1317_v38 }
 0x19f   : >> { %1265 = vrcp.f32 %v941_v56  ;;  %v809_v58 = vpop.f32.mrb[9].mxu0 }
 0x1a0   : >> { %v923_v59 = vpop.f32.mrb[10].mxu1 }
 0x1a1   : >> { %vm938_vm15 = vcmp.gt.f32.partialorder %v923_v59, 0.0  ;;  %v925_v60 = vpop.f32.mrb[11].mxu1 }
 0x1a2   : >> { %v942_v62 = vsel %vm938_vm15, %v923_v59, 1.0  ;;  %v812_v63 = vpop.f32.mrb[10].mxu0  ;;  %v981_v59 = vld [vmem:[%s1558_s24 + $0x50] sm:$0xff] }
 0x1a3   : >> { %1267 = vrcp.f32 %v942_v62  ;;  %v814_v3 = vpop.f32.mrb[11].mxu0 }
 0x1a4   : >> { %v1552_v6 = vpop.f32.mrb[12].mxu1 }
 0x1a5   : >> { %vm939_vm0 = vcmp.gt.f32.partialorder %v1552_v6, 0.0  ;;  %v930_v7 = vpop.f32.mrb[13].mxu1 }
 0x1a6   : >> { %v943_v8 = vsel %vm939_vm0, %v1552_v6, 1.0  ;;  %v817_v9 = vpop.f32.mrb[12].mxu0 }
 0x1a7   : >> { %1269 = vrcp.f32 %v943_v8  ;;  %v819_v10 = vpop.f32.mrb[13].mxu0 }
 0x1a8   : >> { %v1563_v11 = vpop.f32.mrb[14].mxu1 }
 0x1a9   : >> { %v1266_v12 = vpop.eup %1265  ;;  %vm940_vm2 = vcmp.gt.f32.partialorder %v1563_v11, 0.0  ;;  %v935_v15 = vpop.f32.mrb[15].mxu1 }
 0x1aa   : >> { %v957_v0 = vmul.f32 %v1266_v12, %v585_v40  ;;  %v961_v1 = vmul.f32 %v1266_v12, %v696_v37  ;;  %v944_v21 = vsel %vm940_vm2, %v1563_v11, 1.0  ;;  %v822_v23 = vpop.f32.mrb[14].mxu0  ;;  %v965_v25 = vmul.f32 %v1266_v12, %v807_v57  ;;  %v980_v37 = vld [vmem:[%s1558_s24 + $0x48] sm:$0xff]  ;;  %v974_v12 = vld [vmem:[%s1558_s24 + $0x18] sm:$0xff] }
 0x1ab   : >> { %1271 = vrcp.f32 %v944_v21  ;;  %v824_v20 = vpop.f32.mrb[15].mxu0  ;;  %v982_v21 = vld [vmem:[%s1558_s24 + $0x58] sm:$0xff] }
 0x1ac   : >> { %v983_v26 = vsub.f32 %v957_v0, %v971_v13  ;;  %v987_v27 = vsub.f32 %v961_v1, %v975_v14  ;;  %v991_v32 = vsub.f32 %v965_v25, %v979_v22 }
 0x1ad   : >> { %v1268_v28 = vpop.eup %1267 }
 0x1ae   : >> { %v995_v33 = vmul.f32 %v983_v26, %v953_v29  ;;  %v999_v34 = vmul.f32 %v987_v27, %v953_v29  ;;  %v958_v35 = vmul.f32 %v1268_v28, %v590_v44  ;;  %v962_v36 = vmul.f32 %v1268_v28, %v701_v42  ;;  %v973_v42 = vld [vmem:[%s1558_s24 + $0x10] sm:$0xff] }
 0x1af   : >> { %v1003_v39 = vmul.f32 %v991_v32, %v953_v29  ;;  %v966_v40 = vmul.f32 %v1268_v28, %v812_v63  ;;  %v954_v44 = vsel %vm938_vm15, 0.75, %v1317_v38  ;;  %v956_v28 = vsel %vm940_vm2, 0.75, %v1317_v38 }
 0x1b0   : >> { %v1007_v41 = vadd.f32 %v995_v33, %v971_v13  ;;  %v1011_v43 = vadd.f32 %v999_v34, %v975_v14  ;;  %v984_v45 = vsub.f32 %v958_v35, %v972_v30  ;;  %v988_v47 = vsub.f32 %v962_v36, %v976_v31  ;;  %v978_v13 = vld [vmem:[%s1558_s24 + $0x38] sm:$0xff] }
 0x1b1   : >> { %v1270_v49 = vpop.eup %1269  ;;  %v1015_v53 = vadd.f32 %v1003_v39, %v979_v22  ;;  %v992_v54 = vsub.f32 %v966_v40, %v980_v37 }
 0x1b2   : >> { %1021 = vst.msk [vmem:[%s1580_s25] sm:$0xff] %vm1020_vm3, %v1007_v41  ;;  %1025 = vst.msk [vmem:[%s1580_s25 + $0x20] sm:$0xff] %vm1020_vm3, %v1011_v43  ;;  %v996_v55 = vmul.f32 %v984_v45, %v954_v44  ;;  %v1000_v56 = vmul.f32 %v988_v47, %v954_v44  ;;  %v959_v57 = vmul.f32 %v1270_v49, %v1543_v48  ;;  %v955_v48 = vsel %vm939_vm0, 0.75, %v1317_v38 }
 0x1b3   : >> { %v963_v58 = vmul.f32 %v1270_v49, %v1541_v46  ;;  %1029 = vst.msk [vmem:[%s1580_s25 + $0x40] sm:$0xff] %vm1020_vm3, %v1015_v53  ;;  %v1004_v60 = vmul.f32 %v992_v54, %v954_v44  ;;  %v967_v62 = vmul.f32 %v1270_v49, %v817_v9 }
 0x1b4   : >> { %v1008_v63 = vadd.f32 %v996_v55, %v972_v30  ;;  %v1012_v3 = vadd.f32 %v1000_v56, %v976_v31  ;;  %v985_v7 = vsub.f32 %v959_v57, %v973_v42 }
 0x1b5   : >> { %v989_v8 = vsub.f32 %v963_v58, %v977_v51  ;;  %v1272_v10 = vpop.eup %1271  ;;  %v1016_v46 = vadd.f32 %v1004_v60, %v980_v37  ;;  %v993_v14 = vsub.f32 %v967_v62, %v981_v59 }
 0x1b6   : >> { %1022 = vst.msk [vmem:[%s1580_s25 + $0x8] sm:$0xff] %vm1020_vm3, %v1008_v63  ;;  %1026 = vst.msk [vmem:[%s1580_s25 + $0x28] sm:$0xff] %vm1020_vm3, %v1012_v3  ;;  %v997_v9 = vmul.f32 %v985_v7, %v955_v48  ;;  %v960_v0 = vmul.f32 %v1272_v10, %v1547_v52  ;;  %v964_v1 = vmul.f32 %v1272_v10, %v1545_v50 }
 0x1b7   : >> { %v1001_v15 = vmul.f32 %v989_v8, %v955_v48  ;;  %1030 = vst.msk [vmem:[%s1580_s25 + $0x48] sm:$0xff] %vm1020_vm3, %v1016_v46  ;;  %v1005_v6 = vmul.f32 %v993_v14, %v955_v48  ;;  %v968_v22 = vmul.f32 %v1272_v10, %v822_v23 }
 0x1b8   : >> { %v1009_v25 = vadd.f32 %v997_v9, %v973_v42  ;;  %v986_v26 = vsub.f32 %v960_v0, %v974_v12  ;;  %v990_v27 = vsub.f32 %v964_v1, %v978_v13 }
 0x1b9   : >> { %v1013_v20 = vadd.f32 %v1001_v15, %v977_v51  ;;  %v1017_v52 = vadd.f32 %v1005_v6, %v981_v59  ;;  %v994_v29 = vsub.f32 %v968_v22, %v982_v21  ;;  %442 = sbr.rel (!%p440_p6) target bundleno = 171 (0xab), region = 103 }
 0x1ba   : >> { %1023 = vst.msk [vmem:[%s1580_s25 + $0x10] sm:$0xff] %vm1020_vm3, %v1009_v25  ;;  %v998_v50 = vmul.f32 %v986_v26, %v956_v28  ;;  %v1002_v30 = vmul.f32 %v990_v27, %v956_v28 }
 0x1bb   : >> { %1027 = vst.msk [vmem:[%s1580_s25 + $0x30] sm:$0xff] %vm1020_vm3, %v1013_v20  ;;  %1031 = vst.msk [vmem:[%s1580_s25 + $0x50] sm:$0xff] %vm1020_vm3, %v1017_v52  ;;  %v1006_v23 = vmul.f32 %v994_v29, %v956_v28 }
 0x1bc   : >> { %v1010_v31 = vadd.f32 %v998_v50, %v974_v12  ;;  %v1014_v32 = vadd.f32 %v1002_v30, %v978_v13 }
 0x1bd   : >> { %v1018_v33 = vadd.f32 %v1006_v23, %v982_v21 }
 0x1be   : >> { %1024 = vst.msk [vmem:[%s1580_s25 + $0x18] sm:$0xff] %vm1020_vm3, %v1010_v31  ;;  %1028 = vst.msk [vmem:[%s1580_s25 + $0x38] sm:$0xff] %vm1020_vm3, %v1014_v32 }
 0x1bf   : >> { %1032 = vst.msk [vmem:[%s1580_s25 + $0x58] sm:$0xff] %vm1020_vm3, %v1018_v33 }
 0x1c0 PF: > { %s13_s14 = sadd.s32 1, %s1303_s14   ;;  %s1646_s12 = smov %s1299_s13 }
 0x1c1   : > { %p10_p7 = scmp.ge.s32.totalorder %s13_s14, 4   ;;  %s1647_s13 = smov %s1649_s15 }
 0x1c3   :  { %12 = sbr.rel (!%p10_p7) target bundleno = 2 (0x2), region = 114 }

</bundles_post_ra>
